<compile_context>
chip_gen: v7x
topology: tpu7x:2x2x1
jax: 0.10.0
libtpu: 0.0.40
codegen_flags: <defaults>
</compile_context>

<pallas_src>
import math

import jax
import jax.numpy as jnp
from jax.experimental import pallas as pl
from jax.experimental.pallas import tpu as pltpu


LANE = 128      # vreg lane width
SUBLANE = 8     # vreg sublane count (f32)
BM_CAP = 1024   # batch-tile cap (sweepable 512-2048 per review)


def _round_up(x: int, m: int) -> int:
    return (x + m - 1) // m * m


def _pad2d(x, rows, cols):
    r, c = x.shape
    return jnp.pad(x, ((0, rows - r), (0, cols - c)))


# ---------------------------------------------------------------------------
# Pallas kernel: fused Fourier encode + full MLP, everything resident in VMEM
# ---------------------------------------------------------------------------
def _make_fused_kernel(num_mid_layers: int):
    """Refs: (kp, E2, phase, Wkp, Wsincos, b0, [Wi, bi]*mid, Wlast, out)."""

    def kernel(kp_ref, e2_ref, phase_ref, wkp_ref, wsc_ref, b0_ref, *rest):
        o_ref = rest[-1]
        params = rest[:-1]

        kp = kp_ref[...]                                        # (BM, 2N)

        # Packed angles: lanes [0, K) carry kp*freq, lanes [K, 2K) carry the
        # same angles; adding pi/2 to the upper half lets a SINGLE jnp.sin
        # produce [sin(ang) | cos(ang)] in one shot.
        ang = jnp.dot(kp, e2_ref[...], preferred_element_type=jnp.float32)
        z = jnp.sin(ang + phase_ref[...])                       # (BM, 2K)

        # First layer: raw-kp matmul + packed sin/cos matmul + bias.
        h = (jnp.dot(kp, wkp_ref[...], preferred_element_type=jnp.float32)
             + jnp.dot(z, wsc_ref[...], preferred_element_type=jnp.float32)
             + b0_ref[...])
        h = jnp.maximum(h, 0.0)

        # Middle layers: relu(h @ W + b).
        idx = 0
        for _ in range(num_mid_layers):
            w = params[idx][...]
            b = params[idx + 1][...]
            idx += 2
            h = jnp.maximum(
                jnp.dot(h, w, preferred_element_type=jnp.float32) + b, 0.0)

        # Last layer: no bias, no ReLU.
        w_last = params[idx][...]
        o_ref[...] = jnp.dot(
            h, w_last, preferred_element_type=jnp.float32).astype(o_ref.dtype)

    return kernel


# ---------------------------------------------------------------------------
# Parameter init (deterministic, PyTorch-Linear-like uniform init)
# ---------------------------------------------------------------------------
def init_params(key, num_inputs, num_harmonics, num_channels, num_layers,
                output_channels, output_size):
    d_in = num_inputs * (2 + 2 * 2 * num_harmonics)
    d_out = output_channels * output_size ** 2
    # Mirror the PyTorch module: 1 + max(num_layers-2, 0) + 1 linears.
    n_linear = max(num_layers - 2, 0) + 2
    dims = [d_in] + [num_channels] * (n_linear - 1) + [d_out]

    weights, biases = [], []
    keys = jax.random.split(key, 2 * n_linear)
    for i in range(n_linear):
        fan_in, fan_out = dims[i], dims[i + 1]
        bound = 1.0 / math.sqrt(fan_in)
        w = jax.random.uniform(keys[2 * i], (fan_in, fan_out),
                               jnp.float32, -bound, bound)
        weights.append(w)
        if i < n_linear - 1:                      # last linear has bias=False
            b = jax.random.uniform(keys[2 * i + 1], (1, fan_out),
                                   jnp.float32, -bound, bound)
            biases.append(b)
    freq = 2.0 ** jnp.linspace(0.0, num_harmonics - 1, num_harmonics)
    return freq, weights, biases


# ---------------------------------------------------------------------------
# Batch-tile picker: big tiles, prefer divisors of B (no padding / slicing),
# aim for >= 2 grid steps so both v7x TensorCores get batch tiles.
# ---------------------------------------------------------------------------
def _pick_bm(B: int) -> int:
    if B <= SUBLANE:
        return SUBLANE
    target = min(BM_CAP, _round_up(pl.cdiv(B, 2), SUBLANE))
    if B % SUBLANE == 0:
        for bm in range(min(target, B), 0, -SUBLANE):
            if B % bm == 0:
                return bm
    return target


# ---------------------------------------------------------------------------
# Forward pass (Pallas)
# ---------------------------------------------------------------------------
def keypoints_encoder_forward(kp, freq, weights, biases,
                              output_channels, output_size):
    B, N, _ = kp.shape
    H = int(freq.shape[0])
    C = weights[0].shape[1]
    d_out = output_channels * output_size ** 2
    n_linear = len(weights)
    n_mid = n_linear - 2

    two_n = 2 * N
    k_feat = two_n * H
    feat2 = 2 * k_feat            # packed [sin | cos] width (128 at defaults)

    # ---- host-side weight staging (once; shapes are tiny) ------------------
    # PyTorch flatten order: row index of W0 = (n*2 + c)*(1+2H) + feature,
    # feature = [kp, sin_0..sin_{H-1}, cos_0..cos_{H-1}].
    w0 = weights[0].reshape(two_n, 1 + 2 * H, C)
    w_kp = w0[:, 0, :]                                   # (2N, C)
    w_sin = w0[:, 1:1 + H, :].reshape(k_feat, C)         # (2N*H, C)
    w_cos = w0[:, 1 + H:, :].reshape(k_feat, C)          # (2N*H, C)
    w_sc = jnp.concatenate([w_sin, w_cos], axis=0)       # (2*2N*H, C)

    # Block-diagonal frequency matrix, stacked twice along lanes:
    # (kp @ E2)[b, j*H+h]        = kp[b,j]*f_h   (sin half)
    # (kp @ E2)[b, K + j*H+h]    = kp[b,j]*f_h   (cos half, phase +pi/2 below)
    e_mat = (jnp.eye(two_n, dtype=jnp.float32)[:, :, None]
             * freq.astype(jnp.float32)[None, None, :]).reshape(two_n, k_feat)
    e2 = jnp.concatenate([e_mat, e_mat], axis=1)         # (2N, 2K)
    phase = jnp.concatenate(
        [jnp.zeros((1, k_feat), jnp.float32),
         jnp.full((1, k_feat), math.pi / 2, jnp.float32)], axis=1)  # (1, 2K)

    # ---- zero padding of hidden / output lane dims (exact for ReLU MLP) ----
    c_pad = _round_up(C, LANE)
    d_out_pad = _round_up(d_out, LANE)

    w_kp_p = _pad2d(w_kp, two_n, c_pad)
    w_sc_p = _pad2d(w_sc, feat2, c_pad)
    b0_p = _pad2d(biases[0], 1, c_pad)

    flat_params = []
    for i in range(1, n_linear - 1):
        flat_params.append(_pad2d(weights[i], c_pad, c_pad))
        flat_params.append(_pad2d(biases[i], 1, c_pad))
    flat_params.append(_pad2d(weights[-1], c_pad, d_out_pad))

    # ---- batch padding / tiling ---------------------------------------------
    bm = _pick_bm(B)
    b_pad = _round_up(max(B, SUBLANE), bm)
    kp_flat = kp.reshape(B, two_n).astype(jnp.float32)   # natural 2N lane width
    if b_pad != B:
        kp_flat = jnp.pad(kp_flat, ((0, b_pad - B), (0, 0)))

    const_arrays = (e2, phase, w_kp_p, w_sc_p, b0_p, *flat_params)
    const_map = lambda i: (0, 0)                 # weights resident across tiles
    weight_specs = [pl.BlockSpec(a.shape, const_map) for a in const_arrays]

    # Explicit scoped-VMEM budget: double-buffered in/out tiles + weights,
    # floored at 32 MiB, capped at 48 MiB (v7x has 64 MiB physical VMEM).
    const_bytes = 4 * sum(int(a.size) for a in const_arrays)
    io_bytes = 4 * 2 * (bm * two_n + bm * d_out_pad)
    vmem_limit = int(min(max(io_bytes + 2 * const_bytes + (16 << 20),
                             32 << 20), 48 << 20))

    grid = (b_pad // bm,)
    out = pl.pallas_call(
        _make_fused_kernel(n_mid),
        out_shape=jax.ShapeDtypeStruct((b_pad, d_out_pad), jnp.float32),
        grid=grid,
        in_specs=[pl.BlockSpec((bm, two_n), lambda i: (i, 0))] + weight_specs,
        out_specs=pl.BlockSpec((bm, d_out_pad), lambda i: (i, 0)),
        compiler_params=pltpu.CompilerParams(
            dimension_semantics=("parallel",),
            vmem_limit_bytes=vmem_limit),
    )(kp_flat, *const_arrays)

    # Wrapper-side slices only when actually needed (avoid extra HBM pass).
    if d_out_pad != d_out:
        out = out[:, :d_out]
    if b_pad != B:
        out = out[:B]
    return out.reshape(B, output_channels, output_size, output_size)


# ---------------------------------------------------------------------------
# Pure-JAX reference (mirrors the PyTorch module exactly)
# ---------------------------------------------------------------------------
def fourier_encode(kp, freq):
    kpe = kp[..., None]                                   # (B, N, 2, 1)
    ang = kpe * freq.reshape(1, 1, 1, -1)                 # (B, N, 2, H)
    z = jnp.concatenate([kpe, jnp.sin(ang), jnp.cos(ang)], axis=3)
    return z.reshape(z.shape[0], -1)


def reference_forward(kp, freq, weights, biases, output_channels, output_size):
    h = fourier_encode(kp, freq)
    for i in range(len(weights) - 1):
        h = jnp.maximum(h @ weights[i] + biases[i], 0.0)
    h = h @ weights[-1]
    return h.reshape(h.shape[0], output_channels, output_size, output_size)


if __name__ == "__main__":
    # Small, module-consistent shapes.
    B = 2
    num_inputs = 8          # keypoints, each with (x, y)
    num_harmonics = 4
    num_channels = 32
    num_layers = 3
    output_channels = 4
    output_size = 8

    root = jax.random.PRNGKey(0)
    k_param, k_kp = jax.random.split(root)

    freq, weights, biases = init_params(
        k_param, num_inputs, num_harmonics, num_channels, num_layers,
        output_channels, output_size)

    kp = jax.random.uniform(k_kp, (B, num_inputs, 2), jnp.float32, -1.0, 1.0)

    out = keypoints_encoder_forward(kp, freq, weights, biases,
                                    output_channels, output_size)
    out = jax.block_until_ready(out)

    ref = reference_forward(kp, freq, weights, biases,
                            output_channels, output_size)

    assert out.shape == (B, output_channels, output_size, output_size)
    assert jnp.max(jnp.abs(out - ref)) < 1e-4, "mismatch vs. reference"

    print("KERNEL_OK")
</pallas_src>

<mosaic_0001>
module attributes {stable_mosaic.version = 11 : i64} {
  func.func @kernel(%arg0: i32, %arg1: memref<8x16xf32, #tpu.memory_space<vmem>>, %arg2: memref<16x128xf32, #tpu.memory_space<vmem>>, %arg3: memref<1x128xf32, #tpu.memory_space<vmem>>, %arg4: memref<16x128xf32, #tpu.memory_space<vmem>>, %arg5: memref<128x128xf32, #tpu.memory_space<vmem>>, %arg6: memref<1x128xf32, #tpu.memory_space<vmem>>, %arg7: memref<128x128xf32, #tpu.memory_space<vmem>>, %arg8: memref<1x128xf32, #tpu.memory_space<vmem>>, %arg9: memref<128x256xf32, #tpu.memory_space<vmem>>, %arg10: memref<8x256xf32, #tpu.memory_space<vmem>>) attributes {dimension_semantics = [#tpu.dimension_semantics<parallel>], iteration_bounds = array<i64: 1>, scalar_prefetch = 0 : i64, scratch_operands = 0 : i64, tpu.core_type = #tpu.core_type<tc>, window_params = [{transform_indices = @transform_0, window_bounds = array<i64: 8, 16>}, {pipeline_mode = #tpu.pipeline_mode<synchronous>, transform_indices = @transform_1, window_bounds = array<i64: 16, 128>}, {pipeline_mode = #tpu.pipeline_mode<synchronous>, transform_indices = @transform_2, window_bounds = array<i64: 1, 128>}, {pipeline_mode = #tpu.pipeline_mode<synchronous>, transform_indices = @transform_3, window_bounds = array<i64: 16, 128>}, {pipeline_mode = #tpu.pipeline_mode<synchronous>, transform_indices = @transform_4, window_bounds = array<i64: 128, 128>}, {pipeline_mode = #tpu.pipeline_mode<synchronous>, transform_indices = @transform_5, window_bounds = array<i64: 1, 128>}, {pipeline_mode = #tpu.pipeline_mode<synchronous>, transform_indices = @transform_6, window_bounds = array<i64: 128, 128>}, {pipeline_mode = #tpu.pipeline_mode<synchronous>, transform_indices = @transform_7, window_bounds = array<i64: 1, 128>}, {pipeline_mode = #tpu.pipeline_mode<synchronous>, transform_indices = @transform_8, window_bounds = array<i64: 128, 256>}, {transform_indices = @transform_9, window_bounds = array<i64: 8, 256>}]} {
    %c0 = arith.constant 0 : index
    %c0_0 = arith.constant 0 : index
    %0 = vector.load %arg1[%c0, %c0_0] : memref<8x16xf32, #tpu.memory_space<vmem>>, vector<8x16xf32>
    %c0_1 = arith.constant 0 : index
    %c0_2 = arith.constant 0 : index
    %1 = vector.load %arg2[%c0_1, %c0_2] : memref<16x128xf32, #tpu.memory_space<vmem>>, vector<16x128xf32>
    %cst = arith.constant dense<0.000000e+00> : vector<8x128xf32>
    %2 = tpu.matmul %0, %1, %cst {dimension_numbers = #tpu.dot_dimension_numbers<[1], [0], [0], [1], [0, 0, 1, 1], [], []>} : vector<8x16xf32>, vector<16x128xf32>, vector<8x128xf32> -> vector<8x128xf32>
    %c0_3 = arith.constant 0 : index
    %c0_4 = arith.constant 0 : index
    %3 = vector.load %arg3[%c0_3, %c0_4] : memref<1x128xf32, #tpu.memory_space<vmem>>, vector<1x128xf32>
    %4 = vector.broadcast %3 : vector<1x128xf32> to vector<8x128xf32>
    %5 = arith.addf %2, %4 : vector<8x128xf32>
    %6 = math.sin %5 : vector<8x128xf32>
    %c0_5 = arith.constant 0 : index
    %c0_6 = arith.constant 0 : index
    %7 = vector.load %arg4[%c0_5, %c0_6] : memref<16x128xf32, #tpu.memory_space<vmem>>, vector<16x128xf32>
    %cst_7 = arith.constant dense<0.000000e+00> : vector<8x128xf32>
    %8 = tpu.matmul %0, %7, %cst_7 {dimension_numbers = #tpu.dot_dimension_numbers<[1], [0], [0], [1], [0, 0, 1, 1], [], []>} : vector<8x16xf32>, vector<16x128xf32>, vector<8x128xf32> -> vector<8x128xf32>
    %c0_8 = arith.constant 0 : index
    %c0_9 = arith.constant 0 : index
    %9 = vector.load %arg5[%c0_8, %c0_9] : memref<128x128xf32, #tpu.memory_space<vmem>>, vector<128x128xf32>
    %cst_10 = arith.constant dense<0.000000e+00> : vector<8x128xf32>
    %10 = tpu.matmul %6, %9, %cst_10 {dimension_numbers = #tpu.dot_dimension_numbers<[1], [0], [0], [1], [0, 0, 1, 1], [], []>} : vector<8x128xf32>, vector<128x128xf32>, vector<8x128xf32> -> vector<8x128xf32>
    %11 = arith.addf %8, %10 : vector<8x128xf32>
    %c0_11 = arith.constant 0 : index
    %c0_12 = arith.constant 0 : index
    %12 = vector.load %arg6[%c0_11, %c0_12] : memref<1x128xf32, #tpu.memory_space<vmem>>, vector<1x128xf32>
    %13 = vector.broadcast %12 : vector<1x128xf32> to vector<8x128xf32>
    %14 = arith.addf %11, %13 : vector<8x128xf32>
    %cst_13 = arith.constant 0.000000e+00 : f32
    %15 = vector.broadcast %cst_13 : f32 to vector<8x128xf32>
    %16 = arith.maximumf %14, %15 : vector<8x128xf32>
    %c0_14 = arith.constant 0 : index
    %c0_15 = arith.constant 0 : index
    %17 = vector.load %arg7[%c0_14, %c0_15] : memref<128x128xf32, #tpu.memory_space<vmem>>, vector<128x128xf32>
    %c0_16 = arith.constant 0 : index
    %c0_17 = arith.constant 0 : index
    %18 = vector.load %arg8[%c0_16, %c0_17] : memref<1x128xf32, #tpu.memory_space<vmem>>, vector<1x128xf32>
    %cst_18 = arith.constant dense<0.000000e+00> : vector<8x128xf32>
    %19 = tpu.matmul %16, %17, %cst_18 {dimension_numbers = #tpu.dot_dimension_numbers<[1], [0], [0], [1], [0, 0, 1, 1], [], []>} : vector<8x128xf32>, vector<128x128xf32>, vector<8x128xf32> -> vector<8x128xf32>
    %20 = vector.broadcast %18 : vector<1x128xf32> to vector<8x128xf32>
    %21 = arith.addf %19, %20 : vector<8x128xf32>
    %cst_19 = arith.constant 0.000000e+00 : f32
    %22 = vector.broadcast %cst_19 : f32 to vector<8x128xf32>
    %23 = arith.maximumf %21, %22 : vector<8x128xf32>
    %c0_20 = arith.constant 0 : index
    %c0_21 = arith.constant 0 : index
    %24 = vector.load %arg9[%c0_20, %c0_21] : memref<128x256xf32, #tpu.memory_space<vmem>>, vector<128x256xf32>
    %cst_22 = arith.constant dense<0.000000e+00> : vector<8x256xf32>
    %25 = tpu.matmul %23, %24, %cst_22 {dimension_numbers = #tpu.dot_dimension_numbers<[1], [0], [0], [1], [0, 0, 1, 1], [], []>} : vector<8x128xf32>, vector<128x256xf32>, vector<8x256xf32> -> vector<8x256xf32>
    %c0_23 = arith.constant 0 : index
    %c0_24 = arith.constant 0 : index
    %26 = vector.load %arg10[%c0_23, %c0_24] : memref<8x256xf32, #tpu.memory_space<vmem>>, vector<8x256xf32>
    tpu.vector_store %arg10[%c0_23, %c0_24], %25 {strides = array<i32>} : memref<8x256xf32, #tpu.memory_space<vmem>>, vector<8x256xf32>,
    return
  }
  func.func @transform_0(%arg0: i32) -> (i32, i32) {
    %c0_i32 = arith.constant 0 : i32
    %c0_i32_0 = arith.constant 0 : i32
    return %arg0, %c0_i32 : i32, i32
  }
  func.func @transform_1(%arg0: i32) -> (i32, i32) {
    %c0_i32 = arith.constant 0 : i32
    %c0_i32_0 = arith.constant 0 : i32
    %c0_i32_1 = arith.constant 0 : i32
    return %c0_i32, %c0_i32_0 : i32, i32
  }
  func.func @transform_2(%arg0: i32) -> (i32, i32) {
    %c0_i32 = arith.constant 0 : i32
    %c0_i32_0 = arith.constant 0 : i32
    %c0_i32_1 = arith.constant 0 : i32
    return %c0_i32, %c0_i32_0 : i32, i32
  }
  func.func @transform_3(%arg0: i32) -> (i32, i32) {
    %c0_i32 = arith.constant 0 : i32
    %c0_i32_0 = arith.constant 0 : i32
    %c0_i32_1 = arith.constant 0 : i32
    return %c0_i32, %c0_i32_0 : i32, i32
  }
  func.func @transform_4(%arg0: i32) -> (i32, i32) {
    %c0_i32 = arith.constant 0 : i32
    %c0_i32_0 = arith.constant 0 : i32
    %c0_i32_1 = arith.constant 0 : i32
    return %c0_i32, %c0_i32_0 : i32, i32
  }
  func.func @transform_5(%arg0: i32) -> (i32, i32) {
    %c0_i32 = arith.constant 0 : i32
    %c0_i32_0 = arith.constant 0 : i32
    %c0_i32_1 = arith.constant 0 : i32
    return %c0_i32, %c0_i32_0 : i32, i32
  }
  func.func @transform_6(%arg0: i32) -> (i32, i32) {
    %c0_i32 = arith.constant 0 : i32
    %c0_i32_0 = arith.constant 0 : i32
    %c0_i32_1 = arith.constant 0 : i32
    return %c0_i32, %c0_i32_0 : i32, i32
  }
  func.func @transform_7(%arg0: i32) -> (i32, i32) {
    %c0_i32 = arith.constant 0 : i32
    %c0_i32_0 = arith.constant 0 : i32
    %c0_i32_1 = arith.constant 0 : i32
    return %c0_i32, %c0_i32_0 : i32, i32
  }
  func.func @transform_8(%arg0: i32) -> (i32, i32) {
    %c0_i32 = arith.constant 0 : i32
    %c0_i32_0 = arith.constant 0 : i32
    %c0_i32_1 = arith.constant 0 : i32
    return %c0_i32, %c0_i32_0 : i32, i32
  }
  func.func @transform_9(%arg0: i32) -> (i32, i32) {
    %c0_i32 = arith.constant 0 : i32
    %c0_i32_0 = arith.constant 0 : i32
    return %arg0, %c0_i32 : i32, i32
  }
}

</mosaic_0001>

<bundles_post_ra>
// kernel: tpu_custom_call.1
= control target key start
LH: loop header
LB: loop body
LE: loop exit
PB: predicated region body
PF: predicated region fallthrough
CT: control target
= control target key end

     0   :  { %14 = vsyncpa [#allocation3], 0  ;;  %s1324_s0 = inlined_call_operand.hbm [shape: f32[8,16], index: 0, kind: input, shape index: {}]   ;;  %s1325_s1 = inlined_call_operand.hbm [shape: f32[16,128], index: 1, kind: input, shape index: {}]   ;;  %s1326_s2 = inlined_call_operand.vmem [shape: f32[1,128], index: 2, kind: input, shape index: {}]   ;;  %s1327_s3 = inlined_call_operand.hbm [shape: f32[16,128], index: 3, kind: input, shape index: {}]   ;;  %s1328_s4 = inlined_call_operand.hbm [shape: f32[128,128], index: 4, kind: input, shape index: {}]   ;;  %s1329_s5 = inlined_call_operand.vmem [shape: f32[1,128], index: 5, kind: input, shape index: {}]   ;;  %s1330_s6 = inlined_call_operand.hbm [shape: f32[128,128], index: 6, kind: input, shape index: {}]   ;;  %s1331_s7 = inlined_call_operand.vmem [shape: f32[1,128], index: 7, kind: input, shape index: {}]   ;;  %s1332_s8 = inlined_call_operand.hbm [shape: f32[128,256], index: 8, kind: input, shape index: {}]   ;;  %s1333_s9 = inlined_call_operand.hbm [shape: f32[8,256], index: 9, kind: output, shape index: {}]  }
   0x1   :  { %15 = vsyncpa [#allocation6], 0 }
   0x2   :  { %16 = vsyncpa [#allocation9], 0 }
   0x3   :  { %17 = vsyncpa [#allocation12], 0 }
   0x4   :  { %18 = vsyncpa [#allocation4], 0  ;;  %s1096_s30 = smov [#allocation5]   ;;  %s932_s13 = scalar_lea.hbm %s1325_s1, 256 }
   0x5   :  { %s34_s10 = sshll.u32 %s1096_s30, 4  ;;  %p933_p0 = scmp.ne.s32.totalorder %s1325_s1, %s932_s13  ;;  %s35_s10 = int_to_ptr.vmem [resolvable:$true] %s34_s10 }
   0x6   :  { %p936_p1 = scmp.lt.u32.totalorder %s932_s13, %s1325_s1 }
   0x8   :  { %p938_p2 = pnand %p936_p1, %p933_p0 }
   0xa   :  { %941 = shalt.err (!%p938_p2)
}
   0xb   :  { %s942_s18 = scalar_lea.vmem %s35_s10, 256  ;;  %p947_p4 = scmp.lt.s32.totalorder %s35_s10, %s35_s10 }
   0xc   :  { %p943_p3 = scmp.ne.s32.totalorder %s35_s10, %s942_s18  ;;  %p948_p5 = scmp.lt.s32.totalorder %s942_s18, %s942_s18 }
   0xe   :  { %p949_p6 = por %p948_p5, %p947_p4 }
  0x10   :  { %p950_p7 = pnand %p949_p6, %p943_p3 }
  0x12   :  { %953 = shalt.err (!%p950_p7)
}
  0x13   :  { %s1097_s19 = smov 128   ;;  %s1098_s20 = smov 8  }
  0x14   :  { %40 = dma.hbm_to_vmem [thread:$0]  %s1325_s1, 256, %s35_s10, [#allocation6], %s1097_s19, %s1097_s19, %s1098_s20  }
  0x15   :  { %s1099_s23 = smov [#allocation8]   ;;  %s1100_s25 = smov [#allocation2]  }
  0x16   :  { %s60_s24 = sshll.u32 %s1099_s23, 4  ;;  %s25_s26 = sshll.u32 %s1100_s25, 4  ;;  %s61_s24 = int_to_ptr.vmem [resolvable:$true] %s60_s24  ;;  %s26_s26 = int_to_ptr.vmem [resolvable:$true] %s25_s26 }
  0x17   :  { %s954_s29 = scalar_lea.hbm %s1328_s4, 2048 }
  0x18   :  { %p955_p8 = scmp.ne.s32.totalorder %s1328_s4, %s954_s29  ;;  %p958_p9 = scmp.lt.u32.totalorder %s954_s29, %s1328_s4 }
  0x1a   :  { %p960_p10 = pnand %p958_p9, %p955_p8 }
  0x1c   :  { %963 = shalt.err (!%p960_p10)
}
  0x1d   :  { %s964_s1 = scalar_lea.vmem %s61_s24, 2048  ;;  %p969_p12 = scmp.lt.s32.totalorder %s61_s24, %s61_s24 }
  0x1e   :  { %p965_p11 = scmp.ne.s32.totalorder %s61_s24, %s964_s1  ;;  %p970_p13 = scmp.lt.s32.totalorder %s964_s1, %s964_s1 }
  0x20   :  { %p971_p0 = por %p970_p13, %p969_p12 }
  0x22   :  { %p972_p1 = pnand %p971_p0, %p965_p11 }
  0x24   :  { %975 = shalt.err (!%p972_p1)
}
  0x25   :  { %66 = dma.hbm_to_vmem [thread:$0]  %s1328_s4, 2048, %s61_s24, [#allocation9], %s1097_s19, %s1097_s19, %s1098_s20  }
  0x26   :  { %s976_s17 = scalar_lea.hbm %s1324_s0, 128 }
  0x27   :  { %p977_p2 = scmp.ne.s32.totalorder %s1324_s0, %s976_s17  ;;  %p980_p3 = scmp.lt.u32.totalorder %s976_s17, %s1324_s0 }
  0x29   :  { %p982_p4 = pnand %p980_p3, %p977_p2 }
  0x2b   :  { %985 = shalt.err (!%p982_p4)
}
  0x2c   :  { %s986_s25 = scalar_lea.vmem %s26_s26, 128  ;;  %p991_p6 = scmp.lt.s32.totalorder %s26_s26, %s26_s26 }
  0x2d   :  { %p987_p5 = scmp.ne.s32.totalorder %s26_s26, %s986_s25  ;;  %p992_p7 = scmp.lt.s32.totalorder %s986_s25, %s986_s25 }
  0x2f   :  { %p993_p8 = por %p992_p7, %p991_p6 }
  0x31   :  { %p994_p9 = pnand %p993_p8, %p987_p5 }
  0x33   :  { %997 = shalt.err (!%p994_p9)
}
  0x34   :  { %28 = dma.hbm_to_vmem [thread:$0]  %s1324_s0, 128, %s26_s26, [#allocation3]  }
  0x35   :  { %s1101_s27 = smov [#allocation7]   ;;  %s1102_s29 = smov [#allocation10]  }
  0x36   :  { %s48_s28 = sshll.u32 %s1101_s27, 4  ;;  %s74_s30 = sshll.u32 %s1102_s29, 4  ;;  %s49_s28 = int_to_ptr.vmem [resolvable:$true] %s48_s28  ;;  %s75_s30 = int_to_ptr.vmem [resolvable:$true] %s74_s30 }
  0x37   :  { %s998_s13 = scalar_lea.hbm %s1327_s3, 256 }
  0x38   :  { %p999_p10 = scmp.ne.s32.totalorder %s1327_s3, %s998_s13  ;;  %p1002_p11 = scmp.lt.u32.totalorder %s998_s13, %s1327_s3 }
  0x3a   :  { %p1004_p12 = pnand %p1002_p11, %p999_p10 }
  0x3c   :  { %1007 = shalt.err (!%p1004_p12)
}
  0x3d   :  { %s1008_s0 = scalar_lea.vmem %s49_s28, 256  ;;  %p1013_p0 = scmp.lt.s32.totalorder %s49_s28, %s49_s28 }
  0x3e   :  { %p1009_p13 = scmp.ne.s32.totalorder %s49_s28, %s1008_s0  ;;  %p1014_p1 = scmp.lt.s32.totalorder %s1008_s0, %s1008_s0 }
  0x40   :  { %p1015_p2 = por %p1014_p1, %p1013_p0 }
  0x42   :  { %p1016_p3 = pnand %p1015_p2, %p1009_p13 }
  0x44   :  { %1019 = shalt.err (!%p1016_p3)
}
  0x45   :  { %54 = dma.hbm_to_vmem [thread:$0]  %s1327_s3, 256, %s49_s28, [#allocation6], %s1097_s19, %s1097_s19, %s1098_s20  }
  0x46   :  { %s1020_s21 = scalar_lea.hbm %s1330_s6, 2048 }
  0x47   :  { %p1021_p4 = scmp.ne.s32.totalorder %s1330_s6, %s1020_s21  ;;  %p1024_p5 = scmp.lt.u32.totalorder %s1020_s21, %s1330_s6 }
  0x49   :  { %p1026_p6 = pnand %p1024_p5, %p1021_p4 }
  0x4b   :  { %1029 = shalt.err (!%p1026_p6)
}
  0x4c   :  { %s1030_s24 = scalar_lea.vmem %s75_s30, 2048  ;;  %p1035_p8 = scmp.lt.s32.totalorder %s75_s30, %s75_s30 }
  0x4d   :  { %p1031_p7 = scmp.ne.s32.totalorder %s75_s30, %s1030_s24  ;;  %p1036_p9 = scmp.lt.s32.totalorder %s1030_s24, %s1030_s24 }
  0x4f   :  { %p1037_p10 = por %p1036_p9, %p1035_p8 }
  0x51   :  { %p1038_p11 = pnand %p1037_p10, %p1031_p7 }
  0x53   :  { %1041 = shalt.err (!%p1038_p11)
}
  0x54   :  { %80 = dma.hbm_to_vmem [thread:$0]  %s1330_s6, 2048, %s75_s30, [#allocation9], %s1097_s19, %s1097_s19, %s1098_s20  }
  0x55   :  { %s1103_s28 = smov [#allocation11]   ;;  %s1042_s13 = scalar_lea.hbm %s1332_s8, 4096 }
  0x56   :  { %s88_s29 = sshll.u32 %s1103_s28, 4  ;;  %p1043_p12 = scmp.ne.s32.totalorder %s1332_s8, %s1042_s13  ;;  %s89_s29 = int_to_ptr.vmem [resolvable:$true] %s88_s29 }
  0x57   :  { %p1046_p13 = scmp.lt.u32.totalorder %s1042_s13, %s1332_s8 }
  0x59   :  { %p1048_p0 = pnand %p1046_p13, %p1043_p12 }
  0x5b   :  { %1051 = shalt.err (!%p1048_p0)
}
  0x5c   :  { %s1052_s0 = scalar_lea.vmem %s89_s29, 4096  ;;  %p1057_p2 = scmp.lt.s32.totalorder %s89_s29, %s89_s29 }
  0x5d   :  { %p1053_p1 = scmp.ne.s32.totalorder %s89_s29, %s1052_s0  ;;  %p1058_p3 = scmp.lt.s32.totalorder %s1052_s0, %s1052_s0 }
  0x5f   :  { %p1059_p4 = por %p1058_p3, %p1057_p2 }
  0x61   :  { %p1060_p5 = pnand %p1059_p4, %p1053_p1 }
  0x63   :  { %1063 = shalt.err (!%p1060_p5)
}
  0x64   :  { %s1104_s6 = smov 256   ;;  %s1105_s19 = smov 16  }
  0x65   :  { %94 = dma.hbm_to_vmem [thread:$0]  %s1332_s8, 4096, %s89_s29, [#allocation12], %s1104_s6, %s1104_s6, %s1105_s19  }
  0x66   :  { %1086 = dma.done.wait [#allocation3], 128  }
  0x67   :  { %1087 = vsyncadd [#allocation3], 4294967168 }
  0x68   :  { %1088 = dma.done.wait [#allocation6], 512  }
  0x69   :  { %1089 = vsyncadd [#allocation6], 4294966784 }
  0x6a   :  { %1090 = dma.done.wait [#allocation9], 4096  }
  0x6b   :  { %1091 = vsyncadd [#allocation9], 4294963200 }
  0x6c   :  { %1092 = dma.done.wait [#allocation12], 4096  }
  0x6d   :  { %1093 = vsyncadd [#allocation12], 4294963200  ;;  %v1106_v0 = vmov 0.0|0.0   ;;  %vm1107_vm0 = vmmov 0   ;;  %v1108_v1 = vmov 0.0   ;;  %v114_v2 = vld [vmem:[#allocation5] sm:$0xff] }
  0x6e   :  { %818 = vmatprep.subr.bf16.mxu0 %v1106_v0  ;;  %738 = vmatprep.mubr.msk.f32.mxu0 %vm1107_vm0, %v1108_v1  ;;  %v115_v3 = vld [vmem:[#allocation5 + $0x8] sm:$0xff]  ;;  %v113_v5 = vld [vmem:[#allocation2] sm:$0xff]  ;;  %vm123_vm1 = vcmask 130048   ;;  %v303_v6 = vld [vmem:[#allocation8] sm:$0xff] }
  0x6f   :  { %821 = vmatprep.subr.bf16.mxu1 %v1106_v0  ;;  %773 = vmatprep.mubr.msk.f32.mxu1 %vm1107_vm0, %v1108_v1  ;;  %v819_v4 = vpack.c.bf16 %v115_v3, %v114_v2  ;;  %v304_v7 = vld [vmem:[#allocation8 + $0x8] sm:$0xff]  ;;  %v305_v9 = vld [vmem:[#allocation8 + $0x10] sm:$0xff]  ;;  %v306_v10 = vld [vmem:[#allocation8 + $0x18] sm:$0xff]  ;;  %v1109_v3 = vmov 683565275  }
  0x70   :  { %v822_v8 = vpack.c.bf16 %v304_v7, %v303_v6  ;;  %v825_v11 = vpack.c.bf16 %v306_v10, %v305_v9  ;;  %v307_v12 = vld [vmem:[#allocation8 + $0x20] sm:$0xff]  ;;  %v308_v13 = vld [vmem:[#allocation8 + $0x28] sm:$0xff]  ;;  %v309_v15 = vld [vmem:[#allocation8 + $0x30] sm:$0xff] }
  0x71   :  { %820 = vmatpush3.bf16.msra.mxu0 %v819_v4  ;;  %v828_v14 = vpack.c.bf16 %v308_v13, %v307_v12  ;;  %v310_v16 = vld [vmem:[#allocation8 + $0x38] sm:$0xff]  ;;  %v311_v18 = vld [vmem:[#allocation8 + $0x40] sm:$0xff]  ;;  %v312_v19 = vld [vmem:[#allocation8 + $0x48] sm:$0xff] }
  0x72   :  { %845 = vmatprep.subr.bf16.mxu0 %v1106_v0  ;;  %823 = vmatpush3.bf16.msra.mxu1 %v822_v8  ;;  %v831_v17 = vpack.c.bf16 %v310_v16, %v309_v15  ;;  %v834_v20 = vpack.c.bf16 %v312_v19, %v311_v18  ;;  %v313_v21 = vld [vmem:[#allocation8 + $0x50] sm:$0xff]  ;;  %v314_v22 = vld [vmem:[#allocation8 + $0x58] sm:$0xff]  ;;  %v315_v27 = vld [vmem:[#allocation8 + $0x60] sm:$0xff]  ;;  %v1111_v8 = vmov 2131351028  }
  0x73   :  { %824 = vmatprep.subr.bf16.mxu1 %v1106_v0  ;;  %v301_v23 = vld [vmem:[#allocation7] sm:$0xff]  ;;  %v302_v24 = vld [vmem:[#allocation7 + $0x8] sm:$0xff]  ;;  %v837_v26 = vpack.c.bf16 %v314_v22, %v313_v21  ;;  %v316_v28 = vld [vmem:[#allocation8 + $0x68] sm:$0xff] }
  0x74   :  { %739 = vmatmul.mubr.msk.f32.vlgmr.msra.gmra.mrb[0].mxu0 %vm123_vm1, %v113_v5  ;;  %v846_v25 = vpack.c.bf16 %v302_v24, %v301_v23  ;;  %v840_v29 = vpack.c.bf16 %v316_v28, %v315_v27  ;;  %v317_v30 = vld [vmem:[#allocation8 + $0x70] sm:$0xff]  ;;  %v318_v31 = vld [vmem:[#allocation8 + $0x78] sm:$0xff]  ;;  %v468_v33 = vld [vmem:[#allocation10] sm:$0xff] }
  0x75   :  { %780 = vmatprep.mubr.msk.f32.mxu0 %vm1107_vm0, %v1108_v1  ;;  %v843_v32 = vpack.c.bf16 %v318_v31, %v317_v30  ;;  %v469_v34 = vld [vmem:[#allocation10 + $0x8] sm:$0xff]  ;;  %v470_v35 = vld [vmem:[#allocation10 + $0x10] sm:$0xff]  ;;  %v471_v37 = vld [vmem:[#allocation10 + $0x18] sm:$0xff] }
  0x76   :  { %826 = vmatpush3.bf16.msra.mxu1 %v825_v11  ;;  %847 = vmatpush3.bf16.msra.mxu0 %v846_v25  ;;  %v849_v36 = vpack.c.bf16 %v469_v34, %v468_v33  ;;  %v852_v38 = vpack.c.bf16 %v471_v37, %v470_v35  ;;  %v472_v39 = vld [vmem:[#allocation10 + $0x20] sm:$0xff]  ;;  %v473_v40 = vld [vmem:[#allocation10 + $0x28] sm:$0xff]  ;;  %v474_v42 = vld [vmem:[#allocation10 + $0x30] sm:$0xff]  ;;  %v1112_v11 = vmov 2102212464  }
  0x77   :  { %827 = vmatprep.subr.bf16.mxu1 %v1106_v0  ;;  %848 = vmatprep.subr.bf16.mxu0 %v1106_v0  ;;  %v855_v41 = vpack.c.bf16 %v473_v40, %v472_v39  ;;  %v475_v43 = vld [vmem:[#allocation10 + $0x38] sm:$0xff]  ;;  %v476_v45 = vld [vmem:[#allocation10 + $0x40] sm:$0xff]  ;;  %v477_v46 = vld [vmem:[#allocation10 + $0x48] sm:$0xff] }
  0x78   :  { %v858_v44 = vpack.c.bf16 %v475_v43, %v474_v42  ;;  %v861_v47 = vpack.c.bf16 %v477_v46, %v476_v45  ;;  %v478_v48 = vld [vmem:[#allocation10 + $0x50] sm:$0xff]  ;;  %v479_v49 = vld [vmem:[#allocation10 + $0x58] sm:$0xff] }
  0x79   :  { %781 = vmatmul.mubr.msk.f32.vlgmr.msra.gmra.mrb[2].mxu0 %vm123_vm1, %v113_v5  ;;  %v864_v50 = vpack.c.bf16 %v479_v49, %v478_v48  ;;  %v685_v51 = vld [vmem:[%s1326_s2] ss:$0 sm:$0xff]  ;;  %v1110_v5 = vmov 2475754826  }
  0x7a   :  { %829 = vmatpush3.bf16.msra.mxu1 %v828_v14  ;;  %815 = vmatprep.mubr.msk.f32.mxu0 %vm1107_vm0, %v1108_v1  ;;  %v1113_v14 = vmov 920167782  }
  0x7b   :  { %830 = vmatprep.subr.bf16.mxu1 %v1106_v0  ;;  %850 = vmatpush3.bf16.msra.mxu0 %v849_v36 }
  0x7c   :  { %851 = vmatprep.subr.bf16.mxu0 %v1106_v0 }
  0x7e   :  { %832 = vmatpush3.bf16.msra.mxu1 %v831_v17  ;;  %v1114_v17 = vmov 1326507024  }
  0x7f   :  { %833 = vmatprep.subr.bf16.mxu1 %v1106_v0  ;;  %853 = vmatpush3.bf16.msra.mxu0 %v852_v38 }
  0x80   :  { %854 = vmatprep.subr.bf16.mxu0 %v1106_v0 }
  0x82   :  { %835 = vmatpush3.bf16.msra.mxu1 %v834_v20 }
  0x83   :  { %836 = vmatprep.subr.bf16.mxu1 %v1106_v0  ;;  %856 = vmatpush3.bf16.msra.mxu0 %v855_v41 }
  0x84   :  { %857 = vmatprep.subr.bf16.mxu0 %v1106_v0 }
  0x86   :  { %838 = vmatpush3.bf16.msra.mxu1 %v837_v26 }
  0x87   :  { %839 = vmatprep.subr.bf16.mxu1 %v1106_v0  ;;  %859 = vmatpush3.bf16.msra.mxu0 %v858_v44 }
  0x88   :  { %860 = vmatprep.subr.bf16.mxu0 %v1106_v0 }
  0x8a   :  { %841 = vmatpush3.bf16.msra.mxu1 %v840_v29 }
  0x8b   :  { %842 = vmatprep.subr.bf16.mxu1 %v1106_v0  ;;  %862 = vmatpush3.bf16.msra.mxu0 %v861_v47 }
  0x8c   :  { %863 = vmatprep.subr.bf16.mxu0 %v1106_v0 }
  0x8e   :  { %844 = vmatpush3.bf16.msra.mxu1 %v843_v32 }
  0x8f   :  { %865 = vmatpush3.bf16.msra.mxu0 %v864_v50 }
  0x90   :  { %866 = vmatprep.subr.bf16.mxu0 %v1106_v0 }
 0x147   :  { %v193_v52 = vpop.f32.mrb[0].mxu0 }
 0x148   :  { %v1280_v53 = vadd.f32 %v685_v51, %v193_v52  ;;  %v740_v54 = vpop.f32.mrb[1].mxu0 }
 0x14a   :  { %v200_v55 = vand.u32 2139095040, %v1280_v53  ;;  %v197_v59 = vand.u32 2147483647, %v1280_v53  ;;  %vm199_vm9 = vcmp.lt.s32.totalorder %v1280_v53, 0  ;;  %vm289_vm14 = vweird.f32 %v1280_v53 }
 0x14c   :  { %v201_v56 = vshrl.u32 %v200_v55, 23  ;;  %v204_v62 = vand.u32 8388607, %v197_v59  ;;  %vm198_vm10 = vcmp.le.f32.partialorder %v197_v59, 0.7853982 }
 0x14e   :  { %v687_v57 = vadd.s32 4294967169, %v201_v56  ;;  %v205_v19 = vor.u32 8388608, %v204_v62 }
 0x150   :  { %v207_v58 = vadd.s32 1, %v687_v57  ;;  %v245_v33 = vshll.u32 %v205_v19, 8 }
 0x152   :  { %vm208_vm2 = vcmp.gt.s32.totalorder %v207_v58, 0 }
 0x153   :  { %v209_v60 = vsel %vm208_vm2, %v207_v58, 0 }
 0x154   :  { %v211_v61 = vand.u32 31, %v209_v60  ;;  %v210_v2 = vshrl.u32 %v209_v60, 5 }
 0x156   :  { %v212_v63 = vsub.s32 32, %v211_v61  ;;  %v214_v4 = vshll.u32 %v1109_v3, %v211_v61  ;;  %v217_v6 = vshll.u32 %v1110_v5, %v211_v61  ;;  %v220_v10 = vshll.u32 %v1111_v8, %v211_v61 }
 0x157   :  { %v223_v13 = vshll.u32 %v1112_v11, %v211_v61  ;;  %v226_v16 = vshll.u32 %v1113_v14, %v211_v61  ;;  %vm229_vm3 = vcmp.lt.s32.totalorder %v210_v2, 1  ;;  %vm232_vm4 = vcmp.lt.s32.totalorder %v210_v2, 4 }
 0x158   :  { %v215_v7 = vshrl.u32 %v1110_v5, %v212_v63  ;;  %v218_v9 = vshrl.u32 %v1111_v8, %v212_v63  ;;  %v221_v12 = vshrl.u32 %v1112_v11, %v212_v63  ;;  %v224_v15 = vshrl.u32 %v1113_v14, %v212_v63 }
 0x159   :  { %v227_v18 = vshrl.u32 %v1114_v17, %v212_v63  ;;  %v213_v28 = vshrl.u32 %v1109_v3, %v212_v63  ;;  %vm231_vm5 = vcmp.lt.s32.totalorder %v210_v2, 3  ;;  %vm230_vm6 = vcmp.lt.s32.totalorder %v210_v2, 2 }
 0x15a   :  { %v216_v20 = vor.u32 %v215_v7, %v214_v4  ;;  %v219_v21 = vor.u32 %v218_v9, %v217_v6  ;;  %v222_v22 = vor.u32 %v221_v12, %v220_v10  ;;  %v225_v23 = vor.u32 %v224_v15, %v223_v13 }
 0x15b   :  { %v228_v24 = vor.u32 %v227_v18, %v226_v16 }
 0x15c   :  { %v234_v25 = vsel %vm232_vm4, %v222_v22, 2102212464  ;;  %v237_v26 = vsel %vm229_vm3, %v216_v20, %v219_v21  ;;  %v241_v27 = vsel %vm229_vm3, %v219_v21, %v222_v22  ;;  %v238_v29 = vsel %vm232_vm4, %v225_v23, 920167782 }
 0x15d   :  { %v242_v30 = vsel %vm232_vm4, %v228_v24, 1326507024  ;;  %v239_v31 = vsel %vm231_vm5, %v222_v22, %v238_v29  ;;  %v233_v34 = vsel %vm229_vm3, %v213_v28, %v216_v20  ;;  %v235_v35 = vsel %vm231_vm5, %v219_v21, %v234_v25  ;;  %v480_v25 = vld [vmem:[#allocation10 + $0x60] sm:$0xff]  ;;  %v482_v28 = vld [vmem:[#allocation10 + $0x70] sm:$0xff]  ;;  %v483_v29 = vld [vmem:[#allocation10 + $0x78] sm:$0xff] }
 0x15e   :  { %v243_v32 = vsel %vm231_vm5, %v225_v23, %v242_v30  ;;  %v240_v36 = vsel %vm230_vm6, %v237_v26, %v239_v31  ;;  %v236_v42 = vsel %vm230_vm6, %v233_v34, %v235_v35  ;;  %v1302_v23 = vpop.f32.mrb[2].mxu0  ;;  %v481_v26 = vld [vmem:[#allocation10 + $0x68] sm:$0xff]  ;;  %v870_v30 = vpack.c.bf16 %v483_v29, %v482_v28  ;;  %v564_v34 = vld [vmem:[#allocation11 + $0x10] sm:$0xff] }
 0x15f   :  { %v244_v37 = vsel %vm230_vm6, %v241_v27, %v243_v32  ;;  %v1289_v40 = vmul.u32.u64.low %v245_v33, %v240_v36  ;;  %v1290_v41 = vmul.u32.u64.high %v245_v33, %v240_v36, %v1289_v40  ;;  %v252_v44 = vmul.u32 %v245_v33, %v236_v42  ;;  %v782_v24 = vpop.f32.mrb[3].mxu0  ;;  %v563_v31 = vld [vmem:[#allocation11 + $0x8] sm:$0xff]  ;;  %v562_v32 = vld [vmem:[#allocation11] sm:$0xff] }
 0x160   :  { %v1286_v38 = vmul.u32.u64.low %v245_v33, %v244_v37  ;;  %v1287_v39 = vmul.u32.u64.high %v245_v33, %v244_v37, %v1286_v38  ;;  %v867_v27 = vpack.c.bf16 %v481_v26, %v480_v25  ;;  %v567_v35 = vld [vmem:[#allocation11 + $0x28] sm:$0xff]  ;;  %v874_v36 = vpack.c.bf16 %v564_v34, %v562_v32 }
 0x161   :  { %v255_v43 = vadd.s32 1, %v1290_v41  ;;  %v566_v38 = vld [vmem:[#allocation11 + $0x20] sm:$0xff] }
 0x162   :  { %vm254_vm7 = vc.u32 %v1287_v39, %v1289_v40  ;;  %v253_v57 = vadd.s32 %v1289_v40, %v1287_v39  ;;  %868 = vmatpush3.bf16.msra.mxu0 %v867_v27  ;;  %v568_v39 = vld [vmem:[#allocation11 + $0x30] sm:$0xff]  ;;  %v571_v40 = vld [vmem:[#allocation11 + $0x48] sm:$0xff] }
 0x163   :  { %v256_v45 = vsel %vm254_vm7, %v255_v43, %v1290_v41  ;;  %869 = vmatprep.subr.bf16.mxu0 %v1106_v0  ;;  %v573_v41 = vld [vmem:[#allocation11 + $0x58] sm:$0xff]  ;;  %v878_v0 = vpack.c.bf16 %v568_v39, %v566_v38  ;;  %v570_v43 = vld [vmem:[#allocation11 + $0x40] sm:$0xff] }
 0x164   :  { %v257_v46 = vadd.s32 %v256_v45, %v252_v44  ;;  %v880_v42 = vpack.c.bf16 %v573_v41, %v571_v40  ;;  %v572_v44 = vld [vmem:[#allocation11 + $0x50] sm:$0xff]  ;;  %v575_v45 = vld [vmem:[#allocation11 + $0x68] sm:$0xff] }
 0x166   :  { %v258_v47 = vadd.s32 536870912, %v257_v46  ;;  %871 = vmatpush3.bf16.msra.mxu0 %v870_v30 }
 0x168   :  { %v259_v48 = vshrl.u32 %v258_v47, 30  ;;  %v882_v47 = vpack.c.bf16 %v572_v44, %v570_v43 }
 0x16a   :  { %v260_v49 = vshll.u32 %v259_v48, 30  ;;  %v283_v8 = vsub.s32 4, %v259_v48 }
 0x16c   :  { %v261_v50 = vsub.s32 %v257_v46, %v260_v49  ;;  %v284_v11 = vsel %vm199_vm9, %v283_v8, %v259_v48  ;;  %v577_v46 = vld [vmem:[#allocation11 + $0x78] sm:$0xff]  ;;  %v574_v49 = vld [vmem:[#allocation11 + $0x60] sm:$0xff]  ;;  %v588_v8 = vld [vmem:[#allocation11 + $0xd0] sm:$0xff] }
 0x16d   :  { %v286_v13 = vsel %vm198_vm10, 0, %v284_v11  ;;  %v884_v48 = vpack.c.bf16 %v577_v46, %v575_v45  ;;  %v692_v11 = vld [vmem:[%s1329_s5] ss:$0 sm:$0xff]  ;;  %s1115_s5 = smov [#allocation13]  }
 0x16e   :  { %v263_v51 = vsub.s32 0, %v261_v50  ;;  %v290_v14 = vadd.s32 3, %v286_v13  ;;  %s673_s21 = sshll.u32 %s1115_s5, 4  ;;  %s674_s21 = int_to_ptr.vmem [resolvable:$true] %s673_s21 }
 0x16f   :  { %s1064_s22 = scalar_lea.vmem %s674_s21, 256  ;;  %p1069_p7 = scmp.lt.s32.totalorder %s674_s21, %s674_s21 }
 0x170   :  { %v688_v52 = vmin.u32 %v263_v51, %v261_v50  ;;  %v291_v15 = vand.u32 3, %v290_v14  ;;  %v579_v51 = vld [vmem:[#allocation11 + $0x88] sm:$0xff]  ;;  %p1065_p6 = scmp.ne.s32.totalorder %s674_s21, %s1064_s22  ;;  %p1070_p8 = scmp.lt.s32.totalorder %s1064_s22, %s1064_s22 }
 0x172   :  { %v265_v54 = vclz %v688_v52  ;;  %vm296_vm11 = vcmp.eq.s32.totalorder %v291_v15, 2  ;;  %vm293_vm12 = vcmp.eq.s32.totalorder %v291_v15, 0  ;;  %vm292_vm13 = vcmp.lt.s32.totalorder %v291_v15, 2  ;;  %v581_v52 = vld [vmem:[#allocation11 + $0x98] sm:$0xff]  ;;  %p1071_p9 = por %p1070_p8, %p1069_p7 }
 0x174   :  { %v689_v55 = vadd.s32 4294967294, %v265_v54  ;;  %p1072_p10 = pnand %p1071_p9, %p1065_p6 }
 0x176   :  { %vm690_vm8 = vcmp.lt.s32.totalorder %v689_v55, 0 }
 0x177   :  { %v268_v56 = vsel %vm690_vm8, 0, %v689_v55  ;;  %v888_v55 = vpack.c.bf16 %v581_v52, %v579_v51 }
 0x178   :  { %v269_v58 = vsub.s32 32, %v268_v56  ;;  %v273_v60 = vsub.s32 4294967266, %v268_v56  ;;  %v270_v61 = vshll.u32 %v261_v50, %v268_v56  ;;  %v576_v50 = vld [vmem:[#allocation11 + $0x70] sm:$0xff]  ;;  %v578_v56 = vld [vmem:[#allocation11 + $0x80] sm:$0xff] }
 0x179   :  { %v886_v54 = vpack.c.bf16 %v576_v50, %v574_v49 }
 0x17a   :  { %v271_v62 = vshrl.u32 %v253_v57, %v269_v58  ;;  %v274_v63 = vadd.s32 127, %v273_v60  ;;  %v580_v57 = vld [vmem:[#allocation11 + $0x90] sm:$0xff]  ;;  %v583_v58 = vld [vmem:[#allocation11 + $0xa8] sm:$0xff]  ;;  %v585_v60 = vld [vmem:[#allocation11 + $0xb8] sm:$0xff] }
 0x17c   :  { %v272_v2 = vor.u32 %v271_v62, %v270_v61  ;;  %v275_v3 = vshll.u32 %v274_v63, 23  ;;  %v890_v61 = vpack.c.bf16 %v580_v57, %v578_v56  ;;  %v892_v62 = vpack.c.bf16 %v585_v60, %v583_v58  ;;  %v582_v63 = vld [vmem:[#allocation11 + $0xa0] sm:$0xff] }
 0x17e   :  { %v276_v4 = vor.u32 4788187, %v275_v3  ;;  %v279_v6 = vcvt.s32.f32 %v272_v2  ;;  %v584_v2 = vld [vmem:[#allocation11 + $0xb0] sm:$0xff]  ;;  %v587_v3 = vld [vmem:[#allocation11 + $0xc8] sm:$0xff] }
 0x180   :  { %v277_v5 = vand.u32 2147483647, %v276_v4  ;;  %v589_v4 = vld [vmem:[#allocation11 + $0xd8] sm:$0xff] }
 0x182   :  { %v280_v7 = vmul.f32 %v279_v6, %v277_v5  ;;  %v894_v5 = vpack.c.bf16 %v584_v2, %v582_v63  ;;  %v896_v6 = vpack.c.bf16 %v589_v4, %v587_v3 }
 0x184   :  { %v281_v9 = vxor.u32 2147483648, %v280_v7 }
 0x186   :  { %v282_v10 = vsel %vm199_vm9, %v281_v9, %v280_v7  ;;  %v586_v7 = vld [vmem:[#allocation11 + $0xc0] sm:$0xff] }
 0x187   :  { %v285_v12 = vsel %vm198_vm10, %v1280_v53, %v282_v10  ;;  %v565_v53 = vld [vmem:[#allocation11 + $0x18] sm:$0xff]  ;;  %v898_v9 = vpack.c.bf16 %v588_v8, %v586_v7 }
 0x188   :  { %928 = vcosq.f32 %v285_v12  ;;  %v872_v33 = vpack.c.bf16 %v565_v53, %v563_v31 }
 0x189   :  { %930 = vsinq.f32 %v285_v12 }
 0x18a   :  { %873 = vmatprep.subr.bf16.mxu1 %v872_v33 }
 0x192   :  { %v929_v16 = vpop.eup %928 }
 0x193   :  { %v931_v17 = vpop.eup %930  ;;  %v297_v18 = vxor.u32 2147483648, %v929_v16 }
 0x194   :  { %v294_v19 = vxor.u32 2147483648, %v931_v17 }
 0x195   :  { %v298_v20 = vsel %vm296_vm11, %v297_v18, %v931_v17  ;;  %v593_v17 = vld [vmem:[#allocation11 + $0xf8] sm:$0xff] }
 0x196   :  { %v295_v21 = vsel %vm293_vm12, %v929_v16, %v294_v19  ;;  %v591_v16 = vld [vmem:[#allocation11 + $0xe8] sm:$0xff]  ;;  %v590_v19 = vld [vmem:[#allocation11 + $0xe0] sm:$0xff] }
 0x197   :  { %v299_v59 = vsel %vm292_vm13, %v295_v21, %v298_v20  ;;  %v900_v18 = vpack.c.bf16 %v593_v17, %v591_v16  ;;  %v592_v20 = vld [vmem:[#allocation11 + $0xf0] sm:$0xff] }
 0x198   :  { %v300_v22 = vsel %vm289_vm14, nan, %v299_v59  ;;  %v902_v21 = vpack.c.bf16 %v592_v20, %v590_v19  ;;  %v693_v59 = vld [vmem:[%s1331_s7] ss:$0 sm:$0xff] }
 0x199   :  { %774 = vmatmul.mubr.f32.vlgmr.msra.gmra.mrb[0].mxu1 %v300_v22 }
 0x19a   :  { %658 = vmatprep.mubr.f32.mxu1 %v1108_v1  ;;  %v569_v1 = vld [vmem:[#allocation11 + $0x38] sm:$0xff]  ;;  %875 = vmatpush1.bf16.msra.mxu1 %v874_v36 }
 0x19b   :  { %v876_v37 = vpack.c.bf16 %v569_v1, %v567_v35 }
 0x19d   :  { %877 = vmatprep.subr.bf16.mxu1 %v876_v37 }
 0x19e   :  { %879 = vmatpush1.bf16.msra.mxu1 %v878_v0 }
 0x19f   :  { %881 = vmatprep.subr.bf16.mxu1 %v880_v42 }
 0x1a2   :  { %883 = vmatpush1.bf16.msra.mxu1 %v882_v47 }
 0x1a3   :  { %885 = vmatprep.subr.bf16.mxu1 %v884_v48 }
 0x1a6   :  { %887 = vmatpush1.bf16.msra.mxu1 %v886_v54 }
 0x1a7   :  { %889 = vmatprep.subr.bf16.mxu1 %v888_v55 }
 0x1aa   :  { %891 = vmatpush1.bf16.msra.mxu1 %v890_v61 }
 0x1ab   :  { %893 = vmatprep.subr.bf16.mxu1 %v892_v62 }
 0x1ae   :  { %895 = vmatpush1.bf16.msra.mxu1 %v894_v5 }
 0x1af   :  { %897 = vmatprep.subr.bf16.mxu1 %v896_v6 }
 0x1b2   :  { %899 = vmatpush1.bf16.msra.mxu1 %v898_v9 }
 0x1b3   :  { %901 = vmatprep.subr.bf16.mxu1 %v900_v18 }
 0x1b6   :  { %903 = vmatpush1.bf16.msra.mxu1 %v902_v21 }
 0x26c   :  { %v385_v10 = vpop.f32.mrb[0].mxu1 }
 0x26d   :  { %v456_v12 = vadd.f32 %v1302_v23, %v385_v10  ;;  %v775_v13 = vpop.f32.mrb[1].mxu1 }
 0x26f   :  { %v466_v14 = vadd.f32 %v692_v11, %v456_v12 }
 0x271   :  { %v467_v15 = vmax.f32 %v466_v14, 0.0 }
 0x273   :  { %816 = vmatmul.mubr.f32.vlgmr.msra.gmra.mrb[4].mxu0 %v467_v15 }
 0x346   :  { %v557_v22 = vpop.f32.mrb[4].mxu0 }
 0x347   :  { %v558_v24 = vadd.f32 %v693_v59, %v557_v22  ;;  %v817_v25 = vpop.f32.mrb[5].mxu0 }
 0x349   :  { %v561_v23 = vmax.f32 %v558_v24, 0.0 }
 0x34b   :  { %659 = vmatmul.mubr.f32.vlgmr.msra.gmra.mrb[2].mxu1 %v561_v23 }
 0x41e   :  { %v660_v26 = vpop.f32.mrb[2].mxu1 }
 0x41f   :  { %665 = vst [vmem:[#allocation13] sm:$0xff] %v660_v26  ;;  %v662_v27 = vpop.f32.mrb[3].mxu1 }
 0x420   :  { %666 = vst [vmem:[#allocation13 + $0x8] sm:$0xff] %v662_v27 }
 0x421   :  { %1075 = shalt.err (!%p1072_p10)
}
 0x422   :  { %s1076_s25 = scalar_lea.hbm %s1333_s9, 256 }
 0x423   :  { %p1077_p11 = scmp.ne.s32.totalorder %s1333_s9, %s1076_s25  ;;  %p1080_p12 = scmp.lt.u32.totalorder %s1076_s25, %s1333_s9 }
 0x425   :  { %p1082_p13 = pnand %p1080_p12, %p1077_p11 }
 0x427   :  { %1085 = shalt.err (!%p1082_p13)
}
 0x428   :  { %676 = dma.vmem_to_hbm [thread:$0]  %s674_s21, 256, %s1333_s9, [#allocation4]  }
 0x429   :  { %1094 = dma.done.wait [#allocation4], 256  }
 0x42a   :  { %1095 = vsyncadd [#allocation4], 4294967040 }
 0x42b   :  { %680 = vsyncpa [#allocation3], 1 }
 0x42c   :  { %681 = vsyncpa [#allocation6], 1 }
 0x42d   :  { %682 = vsyncpa [#allocation9], 1 }
 0x42e   :  { %683 = vsyncpa [#allocation12], 1 }
 0x42f   :  { %684 = vsyncpa [#allocation4], 1 }

</bundles_post_ra>
